<compile_context>
chip_gen: v7x
topology: tpu7x:2x2x1
jax: 0.10.0
libtpu: 0.0.40
codegen_flags: <defaults>
</compile_context>

<pallas_src>
import math

import jax
import jax.numpy as jnp
from jax.experimental import pallas as pl
from jax.experimental.pallas import tpu as pltpu


def _round_up(n, m):
    return ((n + m - 1) // m) * m


def _combine_linear_kernel(a_ref, b_ref, wa_ref, wb_ref, bias_ref, out_ref):
    # a_ref   : (TR, Ka)   activation tile (f32 or bf16)
    # b_ref   : (TR, Kb)   conditioning tile
    # wa_ref  : (Ka, O)    resident weight (bf16)
    # wb_ref  : (Kb, O)    resident weight (bf16)
    # bias_ref: (1, O)     resident bias (f32)
    # out_ref : (TR, O)
    #
    # cat([a, b], -1) @ W == a @ W[:Ka] + b @ W[Ka:]   (exact, f32 accumulation)
    a = a_ref[...].astype(jnp.bfloat16)
    b = b_ref[...].astype(jnp.bfloat16)
    acc = jnp.dot(a, wa_ref[...], preferred_element_type=jnp.float32)
    acc = acc + jnp.dot(b, wb_ref[...], preferred_element_type=jnp.float32)
    acc = acc + bias_ref[...]
    out_ref[...] = acc.astype(out_ref.dtype)


def _pick_row_tile(R, block_rows):
    """Row tile: multiple of 16 (8 for tiny R), capped at block_rows, aiming
    for >=2 grid steps when R allows (v7x megacore) without exceeding the
    padded row count."""
    g = 16 if R >= 16 else 8
    tr = min(block_rows, _round_up(pl.cdiv(R, 2), g))
    tr = max(g, min(tr, _round_up(R, g)))
    return tr


def _launch(a, b, wa, wb, bias, *, block_rows):
    """out[r] = a[r] @ wa + b[r] @ wb + bias, tiled over rows with a cdiv grid."""
    R, Ka = a.shape
    Kb = b.shape[1]
    O = wa.shape[1]
    tr = _pick_row_tile(R, block_rows)
    grid = (pl.cdiv(R, tr),)

    itemsize = jnp.dtype(a.dtype).itemsize
    cost = pl.CostEstimate(
        flops=2 * R * (Ka + Kb) * O,
        transcendentals=0,
        bytes_accessed=(R * (Ka + Kb) * itemsize          # x, c reads
                        + R * O * itemsize                # out write
                        + (Ka + Kb) * O * 2 + O * 4),     # resident weights/bias
    )

    return pl.pallas_call(
        _combine_linear_kernel,
        out_shape=jax.ShapeDtypeStruct((R, O), a.dtype),
        grid=grid,
        in_specs=[
            pl.BlockSpec((tr, Ka), lambda i: (i, 0)),
            pl.BlockSpec((tr, Kb), lambda i: (i, 0)),
            pl.BlockSpec((Ka, O), lambda i: (0, 0)),   # resident across steps
            pl.BlockSpec((Kb, O), lambda i: (0, 0)),   # resident across steps
            pl.BlockSpec((1, O), lambda i: (0, 0)),    # resident across steps
        ],
        out_specs=pl.BlockSpec((tr, O), lambda i: (i, 0)),
        compiler_params=pltpu.CompilerParams(
            dimension_semantics=("parallel",)),
        cost_estimate=cost,
    )(a, b, wa, wb, bias)


def prepare_combine_linear_params(weight, bias, latent_dim, *,
                                  operand_dtype=jnp.bfloat16):
    """One-time parameter prep (NOT in the per-call hot path).

    weight: (O, L+E) in PyTorch nn.Linear layout; bias: (O,).

    Builds:
      * split, transposed weights w_x (L,O), w_c (E,O) in `operand_dtype`
        and bias (1,O) f32 for the plain path (no in-kernel slicing).
      * block-diagonal weights kron(I_P, w_*) and a tiled bias for the
        lane-dense packed path, where P = lcm(O,128)//O so the packed output
        last dim P*O is a multiple of 128.
    """
    weight = jnp.asarray(weight, dtype=jnp.float32)
    bias = jnp.asarray(bias, dtype=jnp.float32)
    O, K = weight.shape
    L = latent_dim
    E = K - L
    assert 0 < L < K and bias.shape == (O,)

    w_x = weight[:, :L].T.astype(operand_dtype)    # (L, O)
    w_c = weight[:, L:].T.astype(operand_dtype)    # (E, O)
    b2 = bias.reshape(1, O)

    packed = None
    P = math.lcm(O, 128) // O
    if 1 < P <= 32:   # keep the block-diag weights small (resident in VMEM)
        eye = jnp.eye(P, dtype=jnp.float32)
        w_x_bd = jnp.kron(eye, weight[:, :L].T).astype(operand_dtype)  # (P*L, P*O)
        w_c_bd = jnp.kron(eye, weight[:, L:].T).astype(operand_dtype)  # (P*E, P*O)
        b_bd = jnp.tile(bias, P).reshape(1, P * O)                     # (1, P*O)
        packed = (w_x_bd, w_c_bd, b_bd, P)

    return {"w_x": w_x, "w_c": w_c, "b": b2, "packed": packed,
            "L": L, "E": E, "O": O}


def combine_linear(x, c, params, *, block_b=8192):
    """out = cat([x, c], axis=1) @ W.T + bias   (== CombineLinear.forward)."""
    B, L = x.shape
    Bc, E = c.shape
    assert Bc == B and L == params["L"] and E == params["E"]
    O = params["O"]

    packed = params["packed"]
    if packed is not None:
        w_x_bd, w_c_bd, b_bd, P = packed
        if B % P == 0 and B >= P:
            # Lane-dense path: free contiguous reshapes to packed slabs.
            xp = x.reshape(B // P, P * L)
            cp = c.reshape(B // P, P * E)
            out_p = _launch(xp, cp, w_x_bd, w_c_bd, b_bd,
                            block_rows=max(8, block_b // P))
            return out_p.reshape(B, O)   # free contiguous reshape back

    # Plain path (ragged B, or O already lane-dense / packing impractical).
    return _launch(x, c, params["w_x"], params["w_c"], params["b"],
                   block_rows=block_b)


if __name__ == "__main__":
    latent_dim, embed_dim, output_dim = 32, 16, 24

    key = jax.random.PRNGKey(0)
    kw, kb, k1, k2, k3, k4, k5, k6 = jax.random.split(key, 8)

    # nn.Linear-style init: U(-1/sqrt(fan_in), 1/sqrt(fan_in)).
    fan_in = latent_dim + embed_dim
    bound = 1.0 / (fan_in ** 0.5)
    weight = jax.random.uniform(kw, (output_dim, fan_in),
                                minval=-bound, maxval=bound, dtype=jnp.float32)
    bias = jax.random.uniform(kb, (output_dim,),
                              minval=-bound, maxval=bound, dtype=jnp.float32)

    # One-time weight prep (outside the hot path).
    params = prepare_combine_linear_params(weight, bias, latent_dim)
    w_t_bf = jnp.concatenate([params["w_x"], params["w_c"]], axis=0)

    def check(out, x, c, name):
        ref_f32 = jnp.concatenate([x, c], axis=1) @ weight.T + bias
        xc_bf = jnp.concatenate([x, c], axis=1).astype(jnp.bfloat16)
        ref_bf = jnp.dot(xc_bf, w_t_bf, preferred_element_type=jnp.float32) + bias
        assert out.shape == ref_f32.shape, f"{name}: bad shape {out.shape}"
        assert jnp.allclose(out, ref_bf, atol=2e-3, rtol=2e-3), \
            f"{name}: mismatch vs bf16-operand reference"
        assert jnp.allclose(out.astype(jnp.float32), ref_f32,
                            atol=1e-1, rtol=1e-1), \
            f"{name}: mismatch vs f32 reference"

    # --- Small batch (plain path, single grid step). ---
    B = 8
    x = jax.random.normal(k1, (B, latent_dim), dtype=jnp.float32)
    c = jax.random.normal(k2, (B, embed_dim), dtype=jnp.float32)
    out = jax.block_until_ready(combine_linear(x, c, params))
    check(out, x, c, "small")

    # --- Ragged batch (plain path, cdiv grid with a partial last block). ---
    B = 1000
    x = jax.random.normal(k3, (B, latent_dim), dtype=jnp.float32)
    c = jax.random.normal(k4, (B, embed_dim), dtype=jnp.float32)
    out = jax.block_until_ready(combine_linear(x, c, params))
    check(out, x, c, "ragged")

    # --- Large batch, multiple of 16 (lane-dense packed path, >=2 steps). ---
    B = 4096
    x = jax.random.normal(k5, (B, latent_dim), dtype=jnp.float32)
    c = jax.random.normal(k6, (B, embed_dim), dtype=jnp.float32)
    out = jax.block_until_ready(combine_linear(x, c, params))
    check(out, x, c, "packed")

    print("KERNEL_OK")
</pallas_src>

<mosaic_0001>
module attributes {stable_mosaic.version = 11 : i64} {
  func.func @_combine_linear_kernel(%arg0: i32, %arg1: memref<8x32xf32, #tpu.memory_space<vmem>>, %arg2: memref<8x16xf32, #tpu.memory_space<vmem>>, %arg3: memref<32x24xbf16, #tpu.memory_space<vmem>>, %arg4: memref<16x24xbf16, #tpu.memory_space<vmem>>, %arg5: memref<1x24xf32, #tpu.memory_space<vmem>>, %arg6: memref<8x24xf32, #tpu.memory_space<vmem>>) attributes {dimension_semantics = [#tpu.dimension_semantics<parallel>], iteration_bounds = array<i64: 1>, scalar_prefetch = 0 : i64, scratch_operands = 0 : i64, tpu.core_type = #tpu.core_type<tc>, window_params = [{transform_indices = @transform_0, window_bounds = array<i64: 8, 32>}, {transform_indices = @transform_1, window_bounds = array<i64: 8, 16>}, {pipeline_mode = #tpu.pipeline_mode<synchronous>, transform_indices = @transform_2, window_bounds = array<i64: 32, 24>}, {pipeline_mode = #tpu.pipeline_mode<synchronous>, transform_indices = @transform_3, window_bounds = array<i64: 16, 24>}, {pipeline_mode = #tpu.pipeline_mode<synchronous>, transform_indices = @transform_4, window_bounds = array<i64: 1, 24>}, {transform_indices = @transform_5, window_bounds = array<i64: 8, 24>}]} {
    %c0 = arith.constant 0 : index
    %c0_0 = arith.constant 0 : index
    %0 = vector.load %arg1[%c0, %c0_0] : memref<8x32xf32, #tpu.memory_space<vmem>>, vector<8x32xf32>
    %1 = arith.truncf %0 : vector<8x32xf32> to vector<8x32xbf16>
    %c0_1 = arith.constant 0 : index
    %c0_2 = arith.constant 0 : index
    %2 = vector.load %arg2[%c0_1, %c0_2] : memref<8x16xf32, #tpu.memory_space<vmem>>, vector<8x16xf32>
    %3 = arith.truncf %2 : vector<8x16xf32> to vector<8x16xbf16>
    %c0_3 = arith.constant 0 : index
    %c0_4 = arith.constant 0 : index
    %4 = vector.load %arg3[%c0_3, %c0_4] : memref<32x24xbf16, #tpu.memory_space<vmem>>, vector<32x24xbf16>
    %cst = arith.constant dense<0.000000e+00> : vector<8x24xf32>
    %5 = tpu.matmul %1, %4, %cst {dimension_numbers = #tpu.dot_dimension_numbers<[1], [0], [0], [1], [0, 0, 1, 1], [], []>} : vector<8x32xbf16>, vector<32x24xbf16>, vector<8x24xf32> -> vector<8x24xf32>
    %c0_5 = arith.constant 0 : index
    %c0_6 = arith.constant 0 : index
    %6 = vector.load %arg4[%c0_5, %c0_6] : memref<16x24xbf16, #tpu.memory_space<vmem>>, vector<16x24xbf16>
    %cst_7 = arith.constant dense<0.000000e+00> : vector<8x24xf32>
    %7 = tpu.matmul %3, %6, %cst_7 {dimension_numbers = #tpu.dot_dimension_numbers<[1], [0], [0], [1], [0, 0, 1, 1], [], []>} : vector<8x16xbf16>, vector<16x24xbf16>, vector<8x24xf32> -> vector<8x24xf32>
    %8 = arith.addf %5, %7 : vector<8x24xf32>
    %c0_8 = arith.constant 0 : index
    %c0_9 = arith.constant 0 : index
    %9 = vector.load %arg5[%c0_8, %c0_9] : memref<1x24xf32, #tpu.memory_space<vmem>>, vector<1x24xf32>
    %10 = vector.broadcast %9 : vector<1x24xf32> to vector<8x24xf32>
    %11 = arith.addf %8, %10 : vector<8x24xf32>
    %c0_10 = arith.constant 0 : index
    %c0_11 = arith.constant 0 : index
    %12 = vector.load %arg6[%c0_10, %c0_11] : memref<8x24xf32, #tpu.memory_space<vmem>>, vector<8x24xf32>
    tpu.vector_store %arg6[%c0_10, %c0_11], %11 {strides = array<i32>} : memref<8x24xf32, #tpu.memory_space<vmem>>, vector<8x24xf32>,
    return
  }
  func.func @transform_0(%arg0: i32) -> (i32, i32) {
    %c0_i32 = arith.constant 0 : i32
    %c0_i32_0 = arith.constant 0 : i32
    return %arg0, %c0_i32 : i32, i32
  }
  func.func @transform_1(%arg0: i32) -> (i32, i32) {
    %c0_i32 = arith.constant 0 : i32
    %c0_i32_0 = arith.constant 0 : i32
    return %arg0, %c0_i32 : i32, i32
  }
  func.func @transform_2(%arg0: i32) -> (i32, i32) {
    %c0_i32 = arith.constant 0 : i32
    %c0_i32_0 = arith.constant 0 : i32
    %c0_i32_1 = arith.constant 0 : i32
    return %c0_i32, %c0_i32_0 : i32, i32
  }
  func.func @transform_3(%arg0: i32) -> (i32, i32) {
    %c0_i32 = arith.constant 0 : i32
    %c0_i32_0 = arith.constant 0 : i32
    %c0_i32_1 = arith.constant 0 : i32
    return %c0_i32, %c0_i32_0 : i32, i32
  }
  func.func @transform_4(%arg0: i32) -> (i32, i32) {
    %c0_i32 = arith.constant 0 : i32
    %c0_i32_0 = arith.constant 0 : i32
    %c0_i32_1 = arith.constant 0 : i32
    return %c0_i32, %c0_i32_0 : i32, i32
  }
  func.func @transform_5(%arg0: i32) -> (i32, i32) {
    %c0_i32 = arith.constant 0 : i32
    %c0_i32_0 = arith.constant 0 : i32
    return %arg0, %c0_i32 : i32, i32
  }
}

</mosaic_0001>

<bundles_post_ra>
// kernel: tpu_custom_call.1
= control target key start
LH: loop header
LB: loop body
LE: loop exit
PB: predicated region body
PF: predicated region fallthrough
CT: control target
= control target key end

     0   :  { %v217_v1 = vmov 0.0   ;;  %vm218_vm0 = vmmov 0   ;;  %vm38_vm1 = vcmask 130048   ;;  %s280_s0 = inlined_call_operand.vmem [shape: f32[8,32], index: 0, kind: input, shape index: {}]   ;;  %s281_s1 = inlined_call_operand.vmem [shape: f32[8,16], index: 1, kind: input, shape index: {}]   ;;  %s282_s2 = inlined_call_operand.vmem [shape: bf16[32,24], index: 2, kind: input, shape index: {}]   ;;  %s283_s3 = inlined_call_operand.vmem [shape: bf16[16,24], index: 3, kind: input, shape index: {}]   ;;  %s284_s4 = inlined_call_operand.vmem [shape: f32[1,24], index: 4, kind: input, shape index: {}]   ;;  %s285_s5 = inlined_call_operand.hbm [shape: f32[8,24], index: 5, kind: output, shape index: {}]  }
   0x1   :  { %v190_v0 = vld [vmem:[%s282_s2] sm:$0xff]   ;;  %179 = vmatprep.subr.bf16.mxu1 %v217_v1  ;;  %173 = vmatprep.subr.bf16.mxu0 %v217_v1  ;;  %v192_v5 = vld [vmem:[%s282_s2 + $0x8] sm:$0xff]  }
   0x2   :  { %v191_v2 = vld [vmem:[%s283_s3] sm:$0xff]   ;;  %180 = vmatpush3.bf16.msra.mxu1 %v190_v0  ;;  %175 = vmatprep.mubr.msk.bf16.mxu0 %vm218_vm0, %v217_v1 }
   0x3   :  { %v24_v3 = vld [vmem:[%s281_s1] sm:$0xff]  ;;  %174 = vmatpush3.bf16.msra.mxu0 %v191_v2  ;;  %181 = vmatprep.subr.bf16.mxu1 %v217_v1 }
   0x4   :  { %v25_v4 = vpack.c.bf16 %v24_v3, %v24_v3  ;;  %v22_v6 = vld [vmem:[%s280_s0] sm:$0xff] }
   0x5   :  { %10 = vsyncpa [#allocation3], 0  ;;  %183 = vmatprep.mubr.msk.bf16.mxu1 %vm218_vm0, %v217_v1  ;;  %v23_v7 = vpack.c.bf16 %v22_v6, %v22_v6  ;;  %vm94_vm2 = vcmask 261120   ;;  %v167_v13 = vld [vmem:[%s284_s4] ss:$0 sm:$0xff]  ;;  %s219_s2 = smov [#allocation2]  }
   0x6   :  { %176 = vmatmul.mubr.msk.bf16.vlgmr.msra.gmra.mrb[0].mxu0 %vm38_vm1, %v25_v4  ;;  %182 = vmatpush3.bf16.msra.mxu1 %v192_v5  ;;  %s154_s28 = sshll.u32 %s219_s2, 4  ;;  %vm146_vm3 = vcmask 195584   ;;  %s155_s28 = int_to_ptr.vmem [resolvable:$true] %s154_s28 }
   0x7   :  { %s193_s0 = scalar_lea.vmem %s155_s28, 128  ;;  %p198_p1 = scmp.lt.s32.totalorder %s155_s28, %s155_s28 }
   0x8   :  { %p194_p0 = scmp.ne.s32.totalorder %s155_s28, %s193_s0  ;;  %p199_p2 = scmp.lt.s32.totalorder %s193_s0, %s193_s0 }
   0x9   :  { %184 = vmatmul.mubr.msk.bf16.vlgmr.msra.gmra.mrb[0].mxu1 %vm94_vm2, %v23_v7 }
   0xa   :  { %p200_p3 = por %p199_p2, %p198_p1 }
   0xc   :  { %p201_p4 = pnand %p200_p3, %p194_p0 }
  0xd9   :  { %v76_v8 = vpop.f32.mrb[0].mxu0 }
  0xda   :  { %v177_v9 = vpop.f32.mrb[1].mxu0 }
  0xdb   :  { %v79_v10 = vpop.f32.mrb[2].mxu0 }
  0xdc   :  { %v178_v11 = vpop.f32.mrb[3].mxu0  ;;  %v132_v12 = vpop.f32.mrb[0].mxu1 }
  0xdd   :  { %v133_v14 = vadd.f32 %v132_v12, %v76_v8  ;;  %v185_v15 = vpop.f32.mrb[1].mxu1 }
  0xde   :  { %v135_v16 = vpop.f32.mrb[2].mxu1 }
  0xdf   :  { %v145_v17 = vadd.f32 %v167_v13, %v133_v14  ;;  %v186_v18 = vpop.f32.mrb[3].mxu1 }
  0xe1   :  { %147 = vst.msk [vmem:[#allocation2] sm:$0xff] %vm146_vm3, %v145_v17 }
  0xe2   :  { %204 = shalt.err (!%p201_p4)
}
  0xe3   :  { %s205_s4 = scalar_lea.hbm %s285_s5, 128 }
  0xe4   :  { %p206_p5 = scmp.ne.s32.totalorder %s285_s5, %s205_s4  ;;  %p209_p6 = scmp.lt.u32.totalorder %s205_s4, %s285_s5 }
  0xe6   :  { %p211_p7 = pnand %p209_p6, %p206_p5 }
  0xe8   :  { %214 = shalt.err (!%p211_p7)
}
  0xe9   :  { %157 = dma.vmem_to_hbm [thread:$0]  %s155_s28, 128, %s285_s5, [#allocation3]  }
  0xea   :  { %215 = dma.done.wait [#allocation3], 128  }
  0xeb   :  { %216 = vsyncadd [#allocation3], 4294967168 }
  0xec   :  { %161 = vsyncpa [#allocation3], 1 }

</bundles_post_ra>
